<compile_context>
chip_gen: v7x
topology: tpu7x:2x2x1
jax: 0.10.0
libtpu: 0.0.40
codegen_flags: <defaults>
</compile_context>

<pallas_src>
import functools

import jax
import jax.numpy as jnp
from jax.experimental import pallas as pl
from jax.experimental.pallas import tpu as pltpu

_MIB = 1024 * 1024


# --------------------------------------------------------------------------- #
# Chip-aware VMEM budgets
# --------------------------------------------------------------------------- #
@functools.lru_cache(maxsize=1)
def _vmem_budgets():
    """(fused working-set bytes, scoped vmem_limit bytes), derived from the chip."""
    try:
        cap = int(pltpu.get_tpu_info().vmem_capacity_bytes)
    except Exception:
        cap = 64 * _MIB                       # conservative: fits every generation
    cap = max(32 * _MIB, min(cap, 128 * _MIB))
    working_set = (cap * 3) // 4              # v7x: 48 MiB, v5e/v6e: 96 MiB
    vmem_limit = (cap * 7) // 8               # v7x: 56 MiB, v5e/v6e: 112 MiB
    return working_set, vmem_limit


# --------------------------------------------------------------------------- #
# Kernels
# --------------------------------------------------------------------------- #
def ca_fused_kernel(x_ref, w1s_ref, b1_ref, w2_ref, b2_ref, o_ref):
    """Pool + FC + sigmoid + scale for a (Bt, C, HW) slab resident in VMEM."""
    # Lane-sum in f32 (1/HW is folded into w1s on the host).
    pooled = jnp.sum(x_ref[...].astype(jnp.float32), axis=-1)            # (Bt, C)
    h = jnp.dot(pooled, w1s_ref[...],
                preferred_element_type=jnp.float32) + b1_ref[...]        # (Bt, Cr)
    h = jnp.maximum(h, 0.0)                                               # ReLU
    y = jnp.dot(h, w2_ref[...],
                preferred_element_type=jnp.float32) + b2_ref[...]        # (Bt, C)
    y = jax.nn.sigmoid(y)
    # Re-index the ref (VMEM re-reads are free under DMA) instead of keeping a
    # multi-MiB value live across the reduction and the FCs.
    o_ref[...] = (x_ref[...] * y[:, :, None].astype(x_ref.dtype)).astype(o_ref.dtype)


def _make_pool_kernel(HW, thw):
    """HW-tiled pooling pass (f32 accumulator), finished with FC + sigmoid."""
    ragged = (HW % thw) != 0

    def kernel(x_ref, w1s_ref, b1_ref, w2_ref, b2_ref, y_ref, acc_ref):
        t = pl.program_id(1)

        @pl.when(t == 0)
        def _():
            acc_ref[...] = jnp.zeros_like(acc_ref)

        xt = x_ref[...].astype(jnp.float32)                               # (1, C, thw)
        if ragged:
            # Last tile extends past HW; OOB lanes hold undefined data -> mask.
            lane = jax.lax.broadcasted_iota(jnp.int32, xt.shape, 2)
            valid = HW - t * thw
            xt = jnp.where(lane < valid, xt, 0.0)
        acc_ref[...] += jnp.sum(xt, axis=-1)                              # (1, C)

        @pl.when(t == pl.num_programs(1) - 1)
        def _():
            h = jnp.dot(acc_ref[...], w1s_ref[...],
                        preferred_element_type=jnp.float32) + b1_ref[...]  # (1, Cr)
            h = jnp.maximum(h, 0.0)
            y = jnp.dot(h, w2_ref[...],
                        preferred_element_type=jnp.float32) + b2_ref[...]  # (1, C)
            y_ref[...] = jax.nn.sigmoid(y)[None]                           # (1, 1, C)

    return kernel


def ca_scale_kernel(x_ref, y_ref, o_ref):
    """HW-tiled scaling pass: out = x * y broadcast over spatial (lane-dense)."""
    scale = y_ref[0]                                                       # (1, C) f32
    o_ref[...] = (x_ref[...] * scale[:, :, None].astype(x_ref.dtype)).astype(o_ref.dtype)


# --------------------------------------------------------------------------- #
# Tiling heuristics
# --------------------------------------------------------------------------- #
def _choose_batch_tile(B, slab_bytes, budget_bytes):
    """Largest divisor of B whose double-buffered in+out slabs fit the budget,
    capped so the grid keeps >= 2 steps (v7x megacore shards the batch axis)."""
    max_bt = max(1, budget_bytes // (4 * slab_bytes))          # 2x in + 2x out buffers
    cap = max(1, B // 2) if B >= 2 else 1
    bt = 1
    for d in range(1, B + 1):
        if B % d == 0 and d <= max_bt and d <= cap:
            bt = d
    return bt


def _choose_spatial_tile(HW, row_bytes, budget_bytes, n_buffers):
    """Lane-dense spatial tile: either the full extent, or a multiple of 128 that
    fits `n_buffers` copies within the budget (ragged tail handled in-kernel)."""
    max_thw = max(1, budget_bytes // (n_buffers * row_bytes))
    if HW <= max_thw:
        return HW                       # whole spatial extent in one tile
    thw = (max_thw // 128) * 128
    if thw == 0:
        thw = min(HW, 128)              # degenerate budget; stay lane-dense anyway
    return thw


# --------------------------------------------------------------------------- #
# Wrapper
# --------------------------------------------------------------------------- #
def ca_layer(x, w1, b1, w2, b2, *,
             working_set_bytes=None,
             vmem_limit_bytes=None,
             alias_scale_input=True):
    """x: (B, C, H, W) float32 or bfloat16.
    w1: (Cr, C, 1, 1), b1: (Cr,), w2: (C, Cr, 1, 1), b2: (C,)."""
    B, C, H, W = x.shape
    Cr = w1.shape[0]
    HW = H * W
    itemsize = x.dtype.itemsize

    ws_default, vl_default = _vmem_budgets()
    if working_set_bytes is None:
        working_set_bytes = ws_default
    if vmem_limit_bytes is None:
        vmem_limit_bytes = vl_default

    x_flat = x.reshape(B, C, HW)
    # Pre-transpose 1x1-conv weights to row-vector matmul layout (f32) and fold
    # the 1/(H*W) of the average pool into W1 (linear, precedes the ReLU).
    w1_scaled = jnp.transpose(w1.reshape(Cr, C)).astype(jnp.float32) * (1.0 / HW)  # (C, Cr)
    w2_t = jnp.transpose(w2.reshape(C, Cr)).astype(jnp.float32)                    # (Cr, C)
    b1_r = b1.reshape(1, Cr).astype(jnp.float32)
    b2_r = b2.reshape(1, C).astype(jnp.float32)

    slab_bytes = C * HW * itemsize

    if 4 * slab_bytes <= working_set_bytes:
        # ------------------- fused single-pass path -------------------
        bt = _choose_batch_tile(B, slab_bytes, working_set_bytes)
        # TODO(synk): with B == 1 the fused grid has a single step, so one of
        # v7x's two TensorCores idles; splitting HW would require the two-pass
        # structure (1.5x HBM traffic), which only pays off on multi-core chips.
        grid = (B // bt,)
        cost = pl.CostEstimate(
            flops=2 * B * C * HW + 4 * B * C * Cr,
            transcendentals=B * C,
            bytes_accessed=2 * B * C * HW * itemsize)
        out_flat = pl.pallas_call(
            ca_fused_kernel,
            out_shape=jax.ShapeDtypeStruct((B, C, HW), x.dtype),
            grid_spec=pltpu.PrefetchScalarGridSpec(
                num_scalar_prefetch=0,
                grid=grid,
                in_specs=[
                    pl.BlockSpec((bt, C, HW), lambda i: (i, 0, 0)),  # x slab (Bt images)
                    pl.BlockSpec((C, Cr), lambda i: (0, 0)),         # W1^T / HW (resident)
                    pl.BlockSpec((1, Cr), lambda i: (0, 0)),         # b1
                    pl.BlockSpec((Cr, C), lambda i: (0, 0)),         # W2^T
                    pl.BlockSpec((1, C), lambda i: (0, 0)),          # b2
                ],
                out_specs=pl.BlockSpec((bt, C, HW), lambda i: (i, 0, 0)),
            ),
            compiler_params=pltpu.CompilerParams(
                dimension_semantics=("parallel",),
                vmem_limit_bytes=vmem_limit_bytes),
            cost_estimate=cost,
        )(x_flat, w1_scaled, b1_r, w2_t, b2_r)
        return out_flat.reshape(B, C, H, W)

    # --------------- spatially-tiled two-pass path (large H*W) ---------------
    row_bytes = C * itemsize
    # Pool pass has only a tiny (1,1,C) output, so its tiles get the full budget
    # for an input-only double buffer (2x instead of 4x).
    thw_pool = _choose_spatial_tile(HW, row_bytes, working_set_bytes, n_buffers=2)
    n_hw_pool = pl.cdiv(HW, thw_pool)
    # Scale pass double-buffers both input and output tiles (4x).
    thw_scale = _choose_spatial_tile(HW, row_bytes, working_set_bytes, n_buffers=4)
    n_hw_scale = pl.cdiv(HW, thw_scale)

    pool_cost = pl.CostEstimate(
        flops=B * C * HW + 4 * B * C * Cr,
        transcendentals=B * C,
        bytes_accessed=B * C * HW * itemsize + B * C * 4)
    y = pl.pallas_call(
        _make_pool_kernel(HW, thw_pool),
        out_shape=jax.ShapeDtypeStruct((B, 1, C), jnp.float32),
        grid_spec=pltpu.PrefetchScalarGridSpec(
            num_scalar_prefetch=0,
            grid=(B, n_hw_pool),
            in_specs=[
                pl.BlockSpec((1, C, thw_pool), lambda b, t: (b, 0, t)),
                pl.BlockSpec((C, Cr), lambda b, t: (0, 0)),
                pl.BlockSpec((1, Cr), lambda b, t: (0, 0)),
                pl.BlockSpec((Cr, C), lambda b, t: (0, 0)),
                pl.BlockSpec((1, C), lambda b, t: (0, 0)),
            ],
            out_specs=pl.BlockSpec((1, 1, C), lambda b, t: (b, 0, 0)),
            scratch_shapes=[pltpu.VMEM((1, C), jnp.float32)],
        ),
        compiler_params=pltpu.CompilerParams(
            dimension_semantics=("parallel", "arbitrary"),
            vmem_limit_bytes=vmem_limit_bytes),
        cost_estimate=pool_cost,
    )(x_flat, w1_scaled, b1_r, w2_t, b2_r)

    scale_cost = pl.CostEstimate(
        flops=B * C * HW,
        transcendentals=0,
        bytes_accessed=2 * B * C * HW * itemsize + B * C * 4)
    out_flat = pl.pallas_call(
        ca_scale_kernel,
        out_shape=jax.ShapeDtypeStruct((B, C, HW), x.dtype),
        grid_spec=pltpu.PrefetchScalarGridSpec(
            num_scalar_prefetch=0,
            grid=(B, n_hw_scale),
            in_specs=[
                pl.BlockSpec((1, C, thw_scale), lambda b, t: (b, 0, t)),
                pl.BlockSpec((1, 1, C), lambda b, t: (b, 0, 0)),
            ],
            out_specs=pl.BlockSpec((1, C, thw_scale), lambda b, t: (b, 0, t)),
        ),
        compiler_params=pltpu.CompilerParams(
            dimension_semantics=("parallel", "parallel"),
            vmem_limit_bytes=vmem_limit_bytes),
        cost_estimate=scale_cost,
        input_output_aliases={0: 0} if alias_scale_input else {},
    )(x_flat, y)

    return out_flat.reshape(B, C, H, W)


# --------------------------------------------------------------------------- #
# Plain-JAX reference (matches the PyTorch module exactly)
# --------------------------------------------------------------------------- #
def ca_layer_ref(x, w1, b1, w2, b2):
    B, C, H, W = x.shape
    Cr = w1.shape[0]
    y = jnp.mean(x, axis=(2, 3))                              # (B, C)
    y = jnp.maximum(y @ w1.reshape(Cr, C).T + b1, 0.0)        # (B, Cr)
    y = jax.nn.sigmoid(y @ w2.reshape(C, Cr).T + b2)          # (B, C)
    return x * y[:, :, None, None]


if __name__ == "__main__":
    B, C, H, W = 2, 32, 16, 16
    reduction = 16
    Cr = C // reduction

    key = jax.random.PRNGKey(0)
    kx, k1, k2, k3, k4 = jax.random.split(key, 5)

    x = jax.random.normal(kx, (B, C, H, W), dtype=jnp.float32)
    # Conv2d 1x1 weight shapes: (out, in, 1, 1).
    w1 = 0.1 * jax.random.normal(k1, (Cr, C, 1, 1), dtype=jnp.float32)
    b1 = 0.1 * jax.random.normal(k2, (Cr,), dtype=jnp.float32)
    w2 = 0.1 * jax.random.normal(k3, (C, Cr, 1, 1), dtype=jnp.float32)
    b2 = 0.1 * jax.random.normal(k4, (C,), dtype=jnp.float32)

    ref = jax.block_until_ready(ca_layer_ref(x, w1, b1, w2, b2))

    # bf16 streaming input prepared up front (halves HBM traffic when the model
    # already runs in bf16; pooled sum / FCs / sigmoid stay f32 in-kernel).
    x_bf16 = x.astype(jnp.bfloat16)

    # 1) Fused single-pass path (chip-derived VMEM budgets).
    out = jax.block_until_ready(ca_layer(x, w1, b1, w2, b2))
    assert out.shape == x.shape
    assert jnp.allclose(out, ref, atol=1e-5, rtol=1e-5), "fused path mismatch vs reference"

    # 2) Spatially-tiled two-pass fallback (forced via a tiny working-set budget).
    out_tiled = jax.block_until_ready(
        ca_layer(x, w1, b1, w2, b2, working_set_bytes=64 * 1024))
    assert jnp.allclose(out_tiled, ref, atol=1e-5, rtol=1e-5), "tiled path mismatch vs reference"

    # 2b) Ragged spatial extent (HW = 225, not a multiple of 128) through the
    #     fallback: exercises the cdiv grid + in-kernel pool masking + clipped stores.
    x_odd = jax.random.normal(kx, (B, C, 15, 15), dtype=jnp.float32)
    ref_odd = jax.block_until_ready(ca_layer_ref(x_odd, w1, b1, w2, b2))
    out_odd = jax.block_until_ready(
        ca_layer(x_odd, w1, b1, w2, b2, working_set_bytes=48 * 1024))
    assert jnp.allclose(out_odd, ref_odd, atol=1e-5, rtol=1e-5), "ragged tiled path mismatch"

    # 3) bf16 slab path (halved HBM bytes; f32 internals).
    out_bf16 = jax.block_until_ready(ca_layer(x_bf16, w1, b1, w2, b2))
    assert out_bf16.dtype == jnp.bfloat16
    assert jnp.allclose(out_bf16.astype(jnp.float32), ref, atol=5e-2, rtol=5e-2), \
        "bf16 path mismatch vs reference"

    print("KERNEL_OK")
</pallas_src>

<mosaic_0001>
module attributes {stable_mosaic.version = 11 : i64} {
  func.func @ca_fused_kernel(%arg0: i32, %arg1: memref<1x32x256xf32, #tpu.memory_space<vmem>>, %arg2: memref<32x2xf32, #tpu.memory_space<vmem>>, %arg3: memref<1x2xf32, #tpu.memory_space<vmem>>, %arg4: memref<2x32xf32, #tpu.memory_space<vmem>>, %arg5: memref<1x32xf32, #tpu.memory_space<vmem>>, %arg6: memref<1x32x256xf32, #tpu.memory_space<vmem>>) attributes {dimension_semantics = [#tpu.dimension_semantics<parallel>], iteration_bounds = array<i64: 2>, scalar_prefetch = 0 : i64, scratch_operands = 0 : i64, tpu.core_type = #tpu.core_type<tc>, window_params = [{transform_indices = @transform_0, window_bounds = array<i64: 1, 32, 256>}, {pipeline_mode = #tpu.pipeline_mode<synchronous>, transform_indices = @transform_1, window_bounds = array<i64: 32, 2>}, {pipeline_mode = #tpu.pipeline_mode<synchronous>, transform_indices = @transform_2, window_bounds = array<i64: 1, 2>}, {pipeline_mode = #tpu.pipeline_mode<synchronous>, transform_indices = @transform_3, window_bounds = array<i64: 2, 32>}, {pipeline_mode = #tpu.pipeline_mode<synchronous>, transform_indices = @transform_4, window_bounds = array<i64: 1, 32>}, {transform_indices = @transform_5, window_bounds = array<i64: 1, 32, 256>}]} {
    %c0 = arith.constant 0 : index
    %c0_0 = arith.constant 0 : index
    %c0_1 = arith.constant 0 : index
    %0 = vector.load %arg1[%c0, %c0_0, %c0_1] : memref<1x32x256xf32, #tpu.memory_space<vmem>>, vector<1x32x256xf32>
    %cst = arith.constant dense<0.000000e+00> : vector<1x32xf32>
    %1 = vector.multi_reduction <add>, %0, %cst [2] : vector<1x32x256xf32> to vector<1x32xf32>
    %c0_2 = arith.constant 0 : index
    %c0_3 = arith.constant 0 : index
    %2 = vector.load %arg2[%c0_2, %c0_3] : memref<32x2xf32, #tpu.memory_space<vmem>>, vector<32x2xf32>
    %cst_4 = arith.constant dense<0.000000e+00> : vector<1x2xf32>
    %3 = tpu.matmul %1, %2, %cst_4 {dimension_numbers = #tpu.dot_dimension_numbers<[1], [0], [0], [1], [0, 0, 1, 1], [], []>} : vector<1x32xf32>, vector<32x2xf32>, vector<1x2xf32> -> vector<1x2xf32>
    %c0_5 = arith.constant 0 : index
    %c0_6 = arith.constant 0 : index
    %4 = vector.load %arg3[%c0_5, %c0_6] : memref<1x2xf32, #tpu.memory_space<vmem>>, vector<1x2xf32>
    %5 = arith.addf %3, %4 : vector<1x2xf32>
    %cst_7 = arith.constant 0.000000e+00 : f32
    %6 = vector.broadcast %cst_7 : f32 to vector<1x2xf32>
    %7 = arith.maximumf %5, %6 : vector<1x2xf32>
    %c0_8 = arith.constant 0 : index
    %c0_9 = arith.constant 0 : index
    %8 = vector.load %arg4[%c0_8, %c0_9] : memref<2x32xf32, #tpu.memory_space<vmem>>, vector<2x32xf32>
    %cst_10 = arith.constant dense<0.000000e+00> : vector<1x32xf32>
    %9 = tpu.matmul %7, %8, %cst_10 {dimension_numbers = #tpu.dot_dimension_numbers<[1], [0], [0], [1], [0, 0, 1, 1], [], []>} : vector<1x2xf32>, vector<2x32xf32>, vector<1x32xf32> -> vector<1x32xf32>
    %c0_11 = arith.constant 0 : index
    %c0_12 = arith.constant 0 : index
    %10 = vector.load %arg5[%c0_11, %c0_12] : memref<1x32xf32, #tpu.memory_space<vmem>>, vector<1x32xf32>
    %11 = arith.addf %9, %10 : vector<1x32xf32>
    %12 = arith.negf %11 : vector<1x32xf32>
    %13 = math.exp %12 : vector<1x32xf32>
    %cst_13 = arith.constant 1.000000e+00 : f32
    %14 = vector.broadcast %cst_13 : f32 to vector<1x32xf32>
    %15 = arith.addf %14, %13 : vector<1x32xf32>
    %16 = arith.divf %14, %15 : vector<1x32xf32>
    %c0_14 = arith.constant 0 : index
    %c0_15 = arith.constant 0 : index
    %c0_16 = arith.constant 0 : index
    %17 = vector.load %arg1[%c0_14, %c0_15, %c0_16] : memref<1x32x256xf32, #tpu.memory_space<vmem>>, vector<1x32x256xf32>
    %18 = vector.shape_cast %16 : vector<1x32xf32> to vector<1x32x1xf32>
    %19 = vector.broadcast %18 : vector<1x32x1xf32> to vector<1x32x256xf32>
    %20 = arith.mulf %17, %19 : vector<1x32x256xf32>
    %c0_17 = arith.constant 0 : index
    %c0_18 = arith.constant 0 : index
    %c0_19 = arith.constant 0 : index
    %21 = vector.load %arg6[%c0_17, %c0_18, %c0_19] : memref<1x32x256xf32, #tpu.memory_space<vmem>>, vector<1x32x256xf32>
    tpu.vector_store %arg6[%c0_17, %c0_18, %c0_19], %20 {strides = array<i32>} : memref<1x32x256xf32, #tpu.memory_space<vmem>>, vector<1x32x256xf32>,
    return
  }
  func.func @transform_0(%arg0: i32) -> (i32, i32, i32) {
    %c0_i32 = arith.constant 0 : i32
    %c0_i32_0 = arith.constant 0 : i32
    %c0_i32_1 = arith.constant 0 : i32
    return %arg0, %c0_i32, %c0_i32_0 : i32, i32, i32
  }
  func.func @transform_1(%arg0: i32) -> (i32, i32) {
    %c0_i32 = arith.constant 0 : i32
    %c0_i32_0 = arith.constant 0 : i32
    %c0_i32_1 = arith.constant 0 : i32
    return %c0_i32, %c0_i32_0 : i32, i32
  }
  func.func @transform_2(%arg0: i32) -> (i32, i32) {
    %c0_i32 = arith.constant 0 : i32
    %c0_i32_0 = arith.constant 0 : i32
    %c0_i32_1 = arith.constant 0 : i32
    return %c0_i32, %c0_i32_0 : i32, i32
  }
  func.func @transform_3(%arg0: i32) -> (i32, i32) {
    %c0_i32 = arith.constant 0 : i32
    %c0_i32_0 = arith.constant 0 : i32
    %c0_i32_1 = arith.constant 0 : i32
    return %c0_i32, %c0_i32_0 : i32, i32
  }
  func.func @transform_4(%arg0: i32) -> (i32, i32) {
    %c0_i32 = arith.constant 0 : i32
    %c0_i32_0 = arith.constant 0 : i32
    %c0_i32_1 = arith.constant 0 : i32
    return %c0_i32, %c0_i32_0 : i32, i32
  }
  func.func @transform_5(%arg0: i32) -> (i32, i32, i32) {
    %c0_i32 = arith.constant 0 : i32
    %c0_i32_0 = arith.constant 0 : i32
    %c0_i32_1 = arith.constant 0 : i32
    return %arg0, %c0_i32, %c0_i32_0 : i32, i32, i32
  }
}

</mosaic_0001>

<bundles_post_ra>
// kernel: tpu_custom_call.1
= control target key start
LH: loop header
LB: loop body
LE: loop exit
PB: predicated region body
PF: predicated region fallthrough
CT: control target
= control target key end

     0   :  { %10 = vsyncpa [#allocation3], 0  ;;  %s1043_s0 = inlined_call_operand.hbm [shape: f32[2,32,256], index: 0, kind: input, shape index: {}]   ;;  %s1044_s1 = inlined_call_operand.vmem [shape: f32[32,2], index: 1, kind: input, shape index: {}]   ;;  %s1045_s2 = inlined_call_operand.vmem [shape: f32[1,2], index: 2, kind: input, shape index: {}]   ;;  %s1046_s3 = inlined_call_operand.vmem [shape: f32[2,32], index: 3, kind: input, shape index: {}]   ;;  %s1047_s4 = inlined_call_operand.vmem [shape: f32[1,32], index: 4, kind: input, shape index: {}]   ;;  %s1048_s5 = inlined_call_operand.hbm [shape: f32[2,32,256], index: 5, kind: output, shape index: {}]  }
   0x1   :  { %12 = vsyncpa [#allocation3 + $0x1], 0 }
   0x2   :  { %13 = vsyncpa [#allocation4], 0 }
   0x3   :  { %15 = vsyncpa [#allocation4 + $0x1], 0  ;;  %s824_s18 = smov 0   ;;  %s826_s19 = smov 0  }
   0x4   :  { %s828_s20 = smov 0   ;;  %s830_s21 = smov 0  }
   0x5 LB: > { %s845_s22 = sadd.s32 4294967295, %s783_s21   ;;  %s581_s23 = sadd.s32 4294967294, %s783_s21   ;;  %s783_s21 = sphi %s830_s21, %s1061_s21   ;;  %s779_s20 = sphi %s828_s20, %s1060_s20   ;;  %s775_s19 = sphi %s826_s19, %s1059_s19   ;;  %s771_s18 = sphi %s824_s18, %s1058_s18  }
   0x6   : > { %s849_s24 = sadd.s32 1, %s783_s21   ;;  %s28_s25 = sadd.s32 1, %s779_s20 }
   0x7   : > { %s25_s26 = ssub.s32 %s783_s21, %s849_s24  ;;  %p35_p0 = scmp.ne.s32.totalorder %s779_s20, %s775_s19 }
   0x8   : > { %p26_p1 = scmp.eq.s32.totalorder %s25_s26, 0  ;;  %p36_p2 = scmp.eq.s32.totalorder %s783_s21, 0 }
   0x9   : > { %p41_p3 = scmp.ne.s32.totalorder %s775_s19, %s771_s18  ;;  %p42_p4 = scmp.eq.s32.totalorder %s845_s22, 0 }
   0xa   : > { %s861_s27 = scalar_select %p26_p1, %s779_s20, %s28_s25  }
   0xb   : > { %p863_p5 = por %p36_p2, %p35_p0  ;;  %p867_p6 = por %p42_p4, %p41_p3 }
   0xc   : > { %p149_p7 = scmp.eq.s32.totalorder %s845_s22, 1  ;;  %p155_p8 = scmp.eq.s32.totalorder %s581_s23, 1 }
   0xd   : > { %p642_p10 = scmp.lt.s32.totalorder %s783_s21, 2  ;;  %s187_s7 = sand.u32 1, %s779_s20  }
   0xe   : > { %p874_p11 = por %p149_p7, %p35_p0  ;;  %p878_p12 = por %p155_p8, %p41_p3 }
   0xf   : > { %s599_s8 = sshll.u32 %s783_s21, 10  ;;  %s584_s9 = sshll.u32 %s187_s7, 6 }
  0x10   : > { %s1052_s30 = scalar_select %p874_p11, 1, 0 }
  0x11   : > { %s1053_s6 = scalar_select %p878_p12, 1, 0 }
  0x12   : > { %s887_s12 = scalar_lea.hbm %s1043_s0, %s599_s8  ;;  %s191_s13 = scalar_lea.vmem [#allocation2], %s584_s9 }
  0x13   : > { %s198_s14 = sshll.u32 %s191_s13, 4  ;;  %p891_p13 = pnand %p642_p10, %p863_p5  ;;  %s895_s14 = int_to_ptr.vmem [resolvable:$true] %s198_s14 }
  0x14   : > { %s897_s16 = scalar_lea.sflag [#allocation3], %s187_s7  ;;  %s687_s17 = scalar_lea.hbm %s887_s12, 1024 }
  0x15   : > { %p688_p0 = scmp.ne.s32.totalorder %s887_s12, %s687_s17  ;;  %p689_p1 = pneg %p891_p13 }
  0x16   : > { %s692_s26 = scalar_lea.hbm %s1043_s0, 2048  ;;  %p693_p4 = scmp.lt.u32.totalorder %s887_s12, %s1043_s0 }
  0x17   : > { %p690_p2 = pnand %p689_p1, %p688_p0  ;;  %p694_p5 = scmp.lt.u32.totalorder %s692_s26, %s687_s17 }
  0x18   : > { %p696_p8 = scmp.lt.u32.totalorder %s687_s17, %s887_s12 }
  0x19   : > { %p691_p3 = pneg %p690_p2  ;;  %p695_p7 = por %p694_p5, %p693_p4 }
  0x1b   : > { %p697_p10 = por %p696_p8, %p695_p7 }
  0x1d   : > { %p698_p9 = pnand %p697_p10, %p691_p3 }
  0x1f   : > { %701 = shalt.err (!%p698_p9)
}
  0x20   : > { %s702_s7 = scalar_lea.vmem %s895_s14, 1024  ;;  %s785_s9 = smov [#allocation2]  }
  0x21   : > { %p703_p0 = scmp.ne.s32.totalorder %s895_s14, %s702_s7  ;;  %s707_s10 = sshll.u32 %s785_s9, 4  ;;  %s708_s10 = int_to_ptr.vmem [resolvable:$false] %s707_s10 }
  0x22   : > { %s709_s11 = scalar_lea.vmem %s708_s10, 2048  ;;  %p710_p11 = scmp.lt.s32.totalorder %s895_s14, %s708_s10 }
  0x23   : > { %p705_p2 = pnand %p703_p0, %p689_p1  ;;  %p711_p4 = scmp.lt.s32.totalorder %s709_s11, %s702_s7 }
  0x25   : > { %p706_p12 = pneg %p705_p2  ;;  %p712_p5 = por %p711_p4, %p710_p11 }
  0x27   : > { %p713_p7 = pnand %p712_p5, %p706_p12 }
  0x29   : > { %716 = shalt.err (!%p713_p7)
}
  0x2a   : > { %s786_s13 = smov 256   ;;  %s787_s17 = smov 16  }
  0x2b   : > { %637 = dma.hbm_to_vmem [thread:$0]  (!%p891_p13), %s887_s12, 1024, %s895_s14, %s897_s16, %s786_s13, %s786_s13, %s787_s17  }
  0x2c   : > { %p587_p9 = scmp.ge.s32.totalorder %s783_s21, 1  ;;  %p206_p1 = scmp.lt.s32.totalorder %s783_s21, 3 }
  0x2e   : > { %p207_p3 = pnand %p587_p9, %p206_p1 }
  0x2f   : > { %s928_s23 = sand.u32 (!%p207_p3), 1, %s775_s19  }
  0x30   : > { %210 = sbr.rel (%p207_p3) target bundleno = 808 (0x328), region = 40  ;;  %s588_s25 = sshll.u32 (!%p207_p3), %s928_s23, 6 }
  0x31   : > { %s213_s26 = scalar_lea.sflag (!%p207_p3), [#allocation3], %s928_s23  ;;  %s216_s28 = scalar_lea.vmem (!%p207_p3), [#allocation2], %s588_s25 }
  0x37   : > { %762 = dma.done.wait (%p867_p6), %s213_s26, 1024  }
  0x38   : > { %764 = vsyncadd (%p867_p6), %s213_s26, 4294966272  ;;  %v938_v0 = vld [vmem:[%s216_s28] sm:$0xff]  ;;  %v940_v1 = vld [vmem:[%s216_s28 + $0x8] sm:$0xff]  ;;  %v788_v15 = vmov 0.0|0.0   ;;  %vm789_vm0 = vmmov 0   ;;  %v790_v19 = vmov 0.0   ;;  %v272_v20 = vlaneseq }
  0x39   : > { %v942_v2 = vld [vmem:[%s216_s28 + $0x20] sm:$0xff]  ;;  %v251_v3 = vadd.f32 %v940_v1, %v938_v0  ;;  %v946_v4 = vld [vmem:[%s216_s28 + $0x28] sm:$0xff]  ;;  %v948_v5 = vld [vmem:[%s216_s28 + $0x10] sm:$0xff]  ;;  %624 = vmatprep.subr.bf16.mxu0 %v788_v15  ;;  %616 = vmatprep.mubr.msk.f32.mxu0 %vm789_vm0, %v790_v19  ;;  %vm283_vm1 = vcmask 130112   ;;  %vm290_vm2 = vcmask 195712   ;;  %vm297_vm3 = vcmask 261312  }
  0x3a   : > { %v950_v6 = vld [vmem:[%s216_s28 + $0x18] sm:$0xff]  ;;  %v257_v7 = vadd.f32 %v946_v4, %v942_v2  ;;  %v954_v8 = vld [vmem:[%s216_s28 + $0x30] sm:$0xff]  ;;  %v263_v12 = vld [vmem:[%s1044_s1] sm:$0xff]  ;;  %619 = vmatprep.subr.mxu1 %v790_v19  ;;  %621 = vmatprep.mubr.msk.f32.mxu1 %vm789_vm0, %v790_v19  ;;  %v273_v21 = vand.u32 127, %v272_v20  ;;  %v275_v22 = vshrl.u32 %v272_v20, 7  ;;  %vm299_vm4 = vcmask 261120  }
  0x3b   : > { %v956_v9 = vld [vmem:[%s216_s28 + $0x38] sm:$0xff]  ;;  %252 = vadd.xlane.f32.xlu0 %v251_v3  ;;  %v254_v10 = vadd.f32 %v950_v6, %v948_v5  ;;  %v264_v13 = vld [vmem:[%s1044_s1 + $0x8] sm:$0xff]  ;;  %v265_v16 = vld [vmem:[%s1044_s1 + $0x10] sm:$0xff]  ;;  %vm379_vm5 = vcmask 1041408   ;;  %vm375_vm6 = vcmask 15360   ;;  %s242_s29 = scalar_lea.vmem [#allocation5], %s588_s25 }
  0x3c   : > { %258 = vadd.xlane.f32.xlu1 %v257_v7  ;;  %v260_v11 = vadd.f32 %v956_v9, %v954_v8  ;;  %v625_v14 = vpack.c.bf16 %v264_v13, %v263_v12  ;;  %v266_v17 = vld [vmem:[%s1044_s1 + $0x18] sm:$0xff]  ;;  %v278_v23 = vadd.s32 4294967288, %v273_v21  ;;  %v285_v24 = vadd.s32 4294967280, %v273_v21  ;;  %v373_v41 = vld [vmem:[%s1046_s3] sm:$0x3]  ;;  %s508_s12 = sshll.u32 %s242_s29, 4  ;;  %s992_s12 = int_to_ptr.vmem [resolvable:$true] %s508_s12 }
  0x3d   : > { %v628_v18 = vpack.c.bf16 %v266_v17, %v265_v16  ;;  %v292_v25 = vadd.s32 4294967272, %v273_v21  ;;  %v276_v27 = vsub.s32 %v273_v21, %v275_v22  ;;  %620 = vmatpush3.msk.msra.mxu1 %vm379_vm5, %v373_v41  ;;  %v267_v42 = vld [vmem:[%s1045_s2] sm:$0x1]  ;;  %v461_v54 = vsub.s32 0, %v275_v22  ;;  %s600_s14 = sshll.u32 %s845_s22, 10  ;;  %s495_s22 = scalar_lea.sflag [#allocation4], %s928_s23 }
  0x3e   : > { %626 = vmatpush3.bf16.msra.mxu0 %v625_v14  ;;  %v281_v29 = vsub.s32 %v278_v23, %v275_v22  ;;  %v288_v30 = vsub.s32 %v285_v24, %v275_v22  ;;  %v374_v47 = vld [vmem:[%s1047_s4] sm:$0x1]  ;;  %s997_s16 = scalar_lea.hbm %s1048_s5, %s600_s14  ;;  %s717_s8 = scalar_lea.vmem %s992_s12, 1024 }
  0x3f   : > { %255 = vadd.xlane.f32.xlu0 %v254_v10  ;;  %627 = vmatprep.subr.bf16.mxu0 %v788_v15  ;;  %v295_v31 = vsub.s32 %v292_v25, %v275_v22  ;;  %p718_p6 = scmp.ne.s32.totalorder %s992_s12, %s717_s8  ;;  %p1055_p11 = scmp.ne.s32.totalorder %s1052_s30, 0 }
  0x40   : > { %261 = vadd.xlane.f32.xlu1 %v260_v11  ;;  %s791_s7 = smov [#allocation5]  }
  0x41   : > { %p719_p12 = pnand %p718_p6, %p1055_p11  ;;  %s721_s9 = sshll.u32 %s791_s7, 4  ;;  %s722_s9 = int_to_ptr.vmem [resolvable:$false] %s721_s9 }
  0x42   : > { %629 = vmatpush3.bf16.msra.mxu0 %v628_v18  ;;  %s723_s10 = scalar_lea.vmem %s722_s9, 2048  ;;  %p724_p8 = scmp.lt.s32.totalorder %s992_s12, %s722_s9 }
  0x43   : > { %p720_p13 = pneg %p719_p12  ;;  %p725_p10 = scmp.lt.s32.totalorder %s723_s10, %s717_s8 }
  0x45   : > { %p726_p0 = por %p725_p10, %p724_p8 }
  0x47   : > { %p727_p2 = pnand %p726_p0, %p720_p13 }
  0xc8   : > { %v253_v26 = vpop.xlane.xlu0 %252 }
  0xc9   : > { %v259_v28 = vpop.xlane.xlu1 %258  ;;  %v277_v33 = vrot.slane %v253_v26, %v276_v27 }
  0xca   : > { %v289_v36 = vrot.slane %v259_v28, %v288_v30 }
  0xcc   : > { %v256_v32 = vpop.xlane.xlu0 %255 }
  0xcd   : > { %v282_v34 = vrot.slane %v256_v32, %v281_v29  ;;  %v262_v35 = vpop.xlane.xlu1 %261 }
  0xce   : > { %v296_v37 = vrot.slane %v262_v35, %v295_v31 }
  0xcf   : > { %v284_v38 = vsel %vm283_vm1, %v282_v34, %v277_v33 }
  0xd0   : > { %v291_v39 = vsel %vm290_vm2, %v289_v36, %v284_v38 }
  0xd1   : > { %v298_v40 = vsel %vm297_vm3, %v296_v37, %v291_v39 }
  0xd2   : > { %617 = vmatmul.mubr.msk.f32.vlgmr.msra.gmra.mrb[0].mxu0 %vm299_vm4, %v298_v40 }
 0x1a5   : > { %v368_v43 = vpop.f32.mrb[0].mxu0 }
 0x1a6   : > { %v369_v44 = vadd.f32 %v368_v43, %v267_v42  ;;  %v618_v45 = vpop.f32.mrb[1].mxu0 }
 0x1a8   : > { %v372_v46 = vmax.f32 %v369_v44, 0.0 }
 0x1aa   : > { %622 = vmatmul.mubr.msk.f32.vlgmr.msra.gmra.mrb[0].mxu1 %vm375_vm6, %v372_v46 }
 0x27d   : > { %v449_v48 = vpop.f32.mrb[0].mxu1 }
 0x27e   : > { %v450_v49 = vadd.f32 %v449_v48, %v374_v47  ;;  %v623_v50 = vpop.f32.mrb[1].mxu1 }
 0x280   : > { %v593_v51 = vmul.f32 -1.442695, %v450_v49 }
 0x282   : > { %683 = vpow2.f32 %v593_v51 }
 0x28c   : > { %v684_v52 = vpop.eup %683 }
 0x28d   : > { %v456_v53 = vadd.f32 1.0, %v684_v52 }
 0x28f   : > { %685 = vrcp.f32 %v456_v53 }
 0x299   : > { %v686_v55 = vpop.eup %685 }
 0x29a   : > { %v462_v56 = vrot.slane %v686_v55, %v461_v54 }
 0x29c   : > { %468 = vbcast.lane.b32.xlu1 %v462_v56, 264  ;;  %464 = vbcast.lane.b32.xlu0 %v462_v56, 256 }
 0x2a0   : > { %472 = vbcast.lane.b32.xlu1 %v462_v56, 272 }
 0x2a4   : > { %476 = vbcast.lane.b32.xlu1 %v462_v56, 280 }
 0x30e   : > { %v469_v57 = vpop.permute.xlu1 %468  ;;  %v465_v58 = vpop.permute.xlu0 %464 }
 0x30f   : > { %v480_v59 = vmul.f32 %v469_v57, %v948_v5  ;;  %v481_v60 = vmul.f32 %v469_v57, %v950_v6  ;;  %v478_v61 = vmul.f32 %v465_v58, %v938_v0  ;;  %v479_v62 = vmul.f32 %v465_v58, %v940_v1 }
 0x311   : > { %488 = vst [vmem:[%s242_s29 + $0x10] sm:$0xff] %v480_v59  ;;  %489 = vst [vmem:[%s242_s29 + $0x18] sm:$0xff] %v481_v60 }
 0x312   : > { %486 = vst [vmem:[%s242_s29] sm:$0xff] %v478_v61  ;;  %487 = vst [vmem:[%s242_s29 + $0x8] sm:$0xff] %v479_v62  ;;  %v473_v63 = vpop.permute.xlu1 %472 }
 0x313   : > { %v482_v3 = vmul.f32 %v473_v63, %v942_v2  ;;  %v483_v5 = vmul.f32 %v473_v63, %v946_v4 }
 0x315   : > { %490 = vst [vmem:[%s242_s29 + $0x20] sm:$0xff] %v482_v3  ;;  %491 = vst [vmem:[%s242_s29 + $0x28] sm:$0xff] %v483_v5 }
 0x316   : > { %v477_v0 = vpop.permute.xlu1 %476 }
 0x317   : > { %v484_v1 = vmul.f32 %v477_v0, %v954_v8  ;;  %v485_v2 = vmul.f32 %v477_v0, %v956_v9 }
 0x319   : > { %492 = vst [vmem:[%s242_s29 + $0x30] sm:$0xff] %v484_v1  ;;  %493 = vst [vmem:[%s242_s29 + $0x38] sm:$0xff] %v485_v2 }
 0x31a   : > { %730 = shalt.err (!%p727_p2)
}
 0x31b   : > { %s731_s11 = scalar_lea.hbm %s997_s16, 1024  ;;  %s735_s26 = scalar_lea.hbm %s1048_s5, 2048 }
 0x31c   : > { %p732_p4 = scmp.ne.s32.totalorder %s997_s16, %s731_s11  ;;  %p736_p9 = scmp.lt.u32.totalorder %s997_s16, %s1048_s5 }
 0x31d   : > { %p737_p1 = scmp.lt.u32.totalorder %s735_s26, %s731_s11  ;;  %p739_p6 = scmp.lt.u32.totalorder %s731_s11, %s997_s16 }
 0x31e   : > { %p733_p5 = pnand %p732_p4, %p1055_p11 }
 0x31f   : > { %p738_p3 = por %p737_p1, %p736_p9 }
 0x320   : > { %p734_p7 = pneg %p733_p5 }
 0x321   : > { %p740_p12 = por %p739_p6, %p738_p3 }
 0x323   : > { %p741_p13 = pnand %p740_p12, %p734_p7 }
 0x325   : > { %744 = shalt.err (!%p741_p13)
}
 0x326   : > { %s792_s14 = smov 256   ;;  %s793_s25 = smov 16  }
 0x327   : > { %632 = dma.vmem_to_hbm [thread:$0]  (%p1055_p11), %s992_s12, 1024, %s997_s16, %s495_s22, %s792_s14, %s792_s14, %s793_s25  }
 0x328 PF: > { %s523_s15 = sand.u32 1, %s771_s18   ;;  %p1056_p8 = scmp.ne.s32.totalorder %s1053_s6, 0 }
 0x329   : > { %p1057_p10 = scmp.ge.s32.totalorder %s783_s21, 2  ;;  %s524_s8 = scalar_lea.sflag [#allocation4], %s523_s15 }
 0x32b   : > { %p639_p0 = pnand %p1057_p10, %p1056_p8 }
 0x32d   : > { %766 = dma.done.wait (!%p639_p0), %s524_s8, 1024  }
 0x32e   : > { %768 = vsyncadd (!%p639_p0), %s524_s8, 4294966272  ;;  %p18_p2 = scmp.ge.s32.totalorder %s849_s24, 4   ;;  %s1058_s18 = smov %s775_s19 }
 0x32f   : > { %s1059_s19 = smov %s779_s20  ;;  %s1060_s20 = smov %s861_s27 }
 0x330   : > { %s1061_s21 = smov %s849_s24  ;;  %20 = sbr.rel (!%p18_p2) target bundleno = 5 (0x5), region = 85 }
 0x337   :  { %529 = vsyncpa [#allocation3], 1 }
 0x338   :  { %531 = vsyncpa [#allocation3 + $0x1], 1 }
 0x339   :  { %532 = vsyncpa [#allocation4], 1 }
 0x33a   :  { %534 = vsyncpa [#allocation4 + $0x1], 1 }

</bundles_post_ra>
